<compile_context>
chip_gen: v7x
topology: tpu7x:2x2x1
jax: 0.10.0
libtpu: 0.0.40
codegen_flags: <defaults>
</compile_context>

<pallas_src>
import functools

import jax
import jax.numpy as jnp
from jax.experimental import pallas as pl
from jax.experimental.pallas import tpu as pltpu

LANE = 128  # vreg lane width


def _round_up(n, m):
    return ((n + m - 1) // m) * m


def _sublane_pack(dtype):
    # Sublane packing: f32 -> 8, bf16 -> 16, int8/fp8 -> 32.
    return 8 * (4 // jnp.dtype(dtype).itemsize)


def _feat_pad(d):
    # Lane-dense feature padding. Widths <= 128 pad to one MXU column block (fully feeds
    # v5e's 128x128 MXU); wider layers pad to 256 multiples so v6e/v7x's native 256x256
    # MXU tiles are fully utilized.
    return LANE if d <= LANE else _round_up(d, 2 * LANE)


def _vmem_capacity_bytes():
    try:
        cap = getattr(pltpu.get_tpu_info(), "vmem_capacity_bytes", None)
        if cap:
            return int(cap)
    except Exception:
        pass
    return 64 << 20  # conservative fallback: v7x per-TensorCore VMEM


def _mlp_kernel(fold, compute_dtype, *refs):
    """Fused MLP over one batch tile.

    refs = (x_ref, w0[, b0], w1[, b1], ..., o_ref, h_scratch0, h_scratch1)

    Each layer: MXU matmul in the operand dtype with an f32 accumulator
    (preferred_element_type).  When fold[layer] is True the bias lives in a padded row of
    W and the activation carries a ones column, so no VPU bias-add is needed; otherwise an
    explicit f32 bias add is done.  ReLU + downcast after every layer but the last.
    Inter-layer activations ping-pong through VMEM scratch to bound vreg pressure for
    large batch tiles.
    """
    n_layers = len(fold)
    n_params = sum(2 - int(f) for f in fold)
    x_ref = refs[0]
    param_refs = refs[1:1 + n_params]
    o_ref = refs[1 + n_params]
    h_scratch = refs[2 + n_params:4 + n_params]

    h = x_ref[...]  # native operand dtype (bf16 path hits the full-rate MXU)
    p = 0
    for layer in range(n_layers):
        w_ref = param_refs[p]
        p += 1
        acc = jnp.dot(h, w_ref[...], preferred_element_type=jnp.float32)
        if not fold[layer]:
            acc = acc + param_refs[p][...]  # rare path: explicit f32 bias add on the VPU
            p += 1
        if layer < n_layers - 1:
            # max(cast(x), 0) == cast(max(x, 0)), so cast first and run the ReLU in the
            # operand dtype (bf16 VALU on v6e/v7x; lowered to f32 on v5e, still correct).
            act = jnp.maximum(acc.astype(compute_dtype), 0)
            buf = h_scratch[layer % 2]
            buf[:, :act.shape[1]] = act
            h = buf[:, :act.shape[1]]
        else:
            o_ref[...] = acc.astype(o_ref.dtype)


def prepare_params(params, compute_dtype=jnp.bfloat16):
    """Pad + pack (W [in,out], b) pairs for the fused kernel. Call once at init time.

    For layers with a spare padded column, the bias is folded into a padded weight row and
    a "1" entry is planted so the ones column propagates to the next layer through ReLU.
    Weights are cast to compute_dtype (matmul operands); explicit biases stay float32.
    """
    compute_dtype = jnp.dtype(compute_dtype)
    sizes = [params[0][0].shape[0]] + [w.shape[1] for w, _ in params]
    n = len(params)
    in_pads = [_feat_pad(d) for d in sizes[:-1]]
    out_pads = in_pads[1:] + [_feat_pad(sizes[-1])]
    fold = tuple(sizes[l] < in_pads[l] for l in range(n))
    next_fold = [fold[l + 1] if l + 1 < n else False for l in range(n)]

    weights, biases = [], []
    for l, (w, b) in enumerate(params):
        b = jnp.reshape(b, (1, -1)).astype(jnp.float32)
        d_in, d_out = sizes[l], sizes[l + 1]
        wp = jnp.zeros((in_pads[l], out_pads[l]), jnp.float32)
        wp = wp.at[:d_in, :d_out].set(w.astype(jnp.float32))
        bp = None
        if fold[l]:
            wp = wp.at[d_in, :d_out].set(b[0])        # bias row, hit by the ones column
            if next_fold[l]:
                wp = wp.at[d_in, d_out].set(1.0)      # regenerate the ones column
        else:
            bp = jnp.zeros((1, out_pads[l]), jnp.float32).at[0, :d_out].set(b[0])
            if next_fold[l]:
                bp = bp.at[0, d_out].set(1.0)         # create the next layer's ones column
        weights.append(wp.astype(compute_dtype))
        biases.append(bp)

    return dict(weights=weights, biases=biases, fold=fold, widths=tuple(sizes),
                in_pads=tuple(in_pads), out_pads=tuple(out_pads))


def sequential_model_forward(x, packed, *, out_dtype=None, batch_tile=None):
    """Fused MLP forward. x: [batch, input_size]; packed: output of prepare_params()."""
    widths = packed["widths"]
    weights = packed["weights"]
    biases = packed["biases"]
    fold = packed["fold"]
    in_pads = packed["in_pads"]
    out_pads = packed["out_pads"]

    cdt = jnp.dtype(weights[0].dtype)
    odt = jnp.dtype(out_dtype) if out_dtype is not None else cdt
    batch = x.shape[0]
    d0, d_out = widths[0], widths[-1]
    in_pad0, out_pad_last = in_pads[0], out_pads[-1]

    # ---- batch tiling -------------------------------------------------------------
    pack = max(_sublane_pack(cdt), _sublane_pack(odt))
    if batch_tile is None:
        batch_tile = 512 if cdt.itemsize < 4 else 256
    b_aligned = _round_up(batch, pack)
    tile_b = min(_round_up(max(batch_tile, pack), pack), b_aligned)
    # v7x has 2 TensorCores: if the whole batch would be one grid step, split it so the
    # "parallel" grid axis gives both cores work (near-neutral on single-TC v5e/v6e).
    if tile_b >= b_aligned and b_aligned >= 2 * pack:
        tile_b = _round_up((b_aligned + 1) // 2, pack)
    padded_batch = _round_up(batch, tile_b)
    num_tiles = padded_batch // tile_b

    # ---- activation padding (skipped when already aligned) --------------------------
    if padded_batch == batch and x.shape[1] == in_pad0 and x.dtype == cdt:
        x_p = x
    else:
        x_p = jnp.zeros((padded_batch, in_pad0), cdt)
        x_p = x_p.at[:batch, :d0].set(x.astype(cdt))
        if fold[0]:
            x_p = x_p.at[:, d0].set(1.0)  # ones column feeding the folded bias row of W0

    flat_params = []
    for w, b in zip(weights, biases):
        flat_params.append(w)
        if b is not None:
            flat_params.append(b)

    # ---- VMEM accounting / cost hint -------------------------------------------------
    weight_bytes = sum(int(p.size) * p.dtype.itemsize for p in flat_params)
    stage_pads = [w.shape[1] for w in weights[:-1]] or [LANE]
    max_stage = max(stage_pads)
    act_bytes = 2 * tile_b * (in_pad0 * cdt.itemsize + out_pad_last * odt.itemsize)
    scratch_bytes = 2 * tile_b * max_stage * cdt.itemsize
    vmem_budget = int(_vmem_capacity_bytes() * 0.85)  # headroom for Mosaic scratch

    flops = sum(2 * padded_batch * w.shape[0] * w.shape[1] for w in weights)
    bytes_accessed = (padded_batch * in_pad0 * cdt.itemsize
                      + padded_batch * out_pad_last * odt.itemsize + weight_bytes)
    cost = pl.CostEstimate(flops=int(flops), transcendentals=0,
                           bytes_accessed=int(bytes_accessed))

    kernel = functools.partial(_mlp_kernel, fold, cdt)
    out_shape = jax.ShapeDtypeStruct((padded_batch, out_pad_last), odt)
    x_spec = pl.BlockSpec((tile_b, in_pad0), lambda i: (i, 0))
    out_spec = pl.BlockSpec((tile_b, out_pad_last), lambda i: (i, 0))  # lane-dense store
    scratch_shapes = [pltpu.VMEM((tile_b, max_stage), cdt)] * 2

    def build(single_buffer_weights):
        # Weights/biases use a constant index_map so the same VMEM block is reused on
        # every grid step.  With single_buffer_weights, pipeline_mode=pl.Buffered(1)
        # suppresses the pointless second buffer for blocks whose index never changes
        # (halves resident weight VMEM; matters most on v7x's 64 MiB per-core VMEM).
        if single_buffer_weights:
            p_specs = [pl.BlockSpec(p.shape, lambda i: (0, 0),
                                    pipeline_mode=pl.Buffered(1)) for p in flat_params]
            weight_copies = 1
        else:
            p_specs = [pl.BlockSpec(p.shape, lambda i: (0, 0)) for p in flat_params]
            weight_copies = 2
        vmem_needed = weight_copies * weight_bytes + act_bytes + scratch_bytes + (1 << 20)
        # TODO(synk): if vmem_needed exceeds vmem_budget (very large MLPs, esp. v7x),
        # stream weights with a K/layer grid axis or pltpu.emit_pipeline instead of
        # keeping everything resident.
        cp_kwargs = dict(dimension_semantics=("parallel",))
        if vmem_needed > (16 << 20):
            cp_kwargs["vmem_limit_bytes"] = int(min(vmem_needed, vmem_budget))
        return pl.pallas_call(
            kernel,
            out_shape=out_shape,
            grid=(num_tiles,),
            in_specs=[x_spec] + p_specs,
            out_specs=out_spec,
            scratch_shapes=scratch_shapes,
            compiler_params=pltpu.CompilerParams(**cp_kwargs),
            cost_estimate=cost,
        )

    try:
        out_p = build(single_buffer_weights=True)(x_p, *flat_params)
    except Exception:
        # This jax/Mosaic build rejected pl.Buffered(1); fall back to the default
        # double-buffered (still VMEM-resident) weight blocks — correct, just 2x weight VMEM.
        out_p = build(single_buffer_weights=False)(x_p, *flat_params)

    if padded_batch == batch and out_pad_last == d_out:
        return out_p
    return out_p[:batch, :d_out]


def init_params(key, input_size, output_size, hidden_layers):
    """Deterministic synthetic parameter init (shapes match the nn.Linear layers)."""
    sizes = [input_size] + list(hidden_layers) + [output_size]
    params = []
    for i in range(len(sizes) - 1):
        key, wk, bk = jax.random.split(key, 3)
        fan_in, fan_out = sizes[i], sizes[i + 1]
        scale = 1.0 / jnp.sqrt(fan_in).astype(jnp.float32)
        w = jax.random.uniform(wk, (fan_in, fan_out), jnp.float32, minval=-scale, maxval=scale)
        b = jax.random.uniform(bk, (1, fan_out), jnp.float32, minval=-scale, maxval=scale)
        params.append((w, b))
    return params


def reference_forward(x, params):
    h = x
    for i, (w, b) in enumerate(params):
        h = h @ w + b
        if i < len(params) - 1:
            h = jnp.maximum(h, 0.0)
    return h


if __name__ == "__main__":
    # Small shapes consistent with SequentialModel(input_size, output_size, hidden_layers)
    batch = 8
    input_size = 16
    hidden_layers = [32, 32]
    output_size = 8

    key = jax.random.PRNGKey(0)
    key, xk = jax.random.split(key)
    x = jax.random.normal(xk, (batch, input_size), jnp.float32)

    params = init_params(key, input_size, output_size, hidden_layers)
    ref = reference_forward(x, params)

    # float32 operand path: correctness/reference mode (exact zero-padding, f32 MXU acc)
    packed_f32 = prepare_params(params, compute_dtype=jnp.float32)
    out = sequential_model_forward(x, packed_f32)
    out = jax.block_until_ready(out)
    assert out.shape == (batch, output_size)
    assert jnp.allclose(out, ref, atol=1e-5, rtol=1e-4), "f32 mismatch vs reference"

    # bfloat16 operand path (default): full-rate MXU, f32 accumulation — loose tolerance
    packed_bf16 = prepare_params(params)  # default compute_dtype = bfloat16
    out_bf16 = sequential_model_forward(x, packed_bf16)
    out_bf16 = jax.block_until_ready(out_bf16)
    assert out_bf16.shape == (batch, output_size)
    assert jnp.allclose(out_bf16.astype(jnp.float32), ref, atol=1e-1, rtol=1e-1), \
        "bf16 mismatch vs reference"

    print("KERNEL_OK")
</pallas_src>

<mosaic_0001>
module attributes {stable_mosaic.version = 11 : i64} {
  func.func @_mlp_kernel(%arg0: i32, %arg1: memref<8x128xf32, #tpu.memory_space<vmem>>, %arg2: memref<128x128xf32, #tpu.memory_space<vmem>>, %arg3: memref<128x128xf32, #tpu.memory_space<vmem>>, %arg4: memref<128x128xf32, #tpu.memory_space<vmem>>, %arg5: memref<8x128xf32, #tpu.memory_space<vmem>>, %arg6: memref<8x128xf32, #tpu.memory_space<vmem>>, %arg7: memref<8x128xf32, #tpu.memory_space<vmem>>) attributes {dimension_semantics = [#tpu.dimension_semantics<parallel>], iteration_bounds = array<i64: 1>, scalar_prefetch = 0 : i64, scratch_operands = 2 : i64, tpu.core_type = #tpu.core_type<tc>, window_params = [{transform_indices = @transform_0, window_bounds = array<i64: 8, 128>}, {pipeline_mode = #tpu.pipeline_mode<synchronous>, transform_indices = @transform_1, window_bounds = array<i64: 128, 128>}, {pipeline_mode = #tpu.pipeline_mode<synchronous>, transform_indices = @transform_2, window_bounds = array<i64: 128, 128>}, {pipeline_mode = #tpu.pipeline_mode<synchronous>, transform_indices = @transform_3, window_bounds = array<i64: 128, 128>}, {transform_indices = @transform_4, window_bounds = array<i64: 8, 128>}]} {
    %c0 = arith.constant 0 : index
    %c0_0 = arith.constant 0 : index
    %0 = vector.load %arg1[%c0, %c0_0] : memref<8x128xf32, #tpu.memory_space<vmem>>, vector<8x128xf32>
    %c0_1 = arith.constant 0 : index
    %c0_2 = arith.constant 0 : index
    %1 = vector.load %arg2[%c0_1, %c0_2] : memref<128x128xf32, #tpu.memory_space<vmem>>, vector<128x128xf32>
    %cst = arith.constant dense<0.000000e+00> : vector<8x128xf32>
    %2 = tpu.matmul %0, %1, %cst {dimension_numbers = #tpu.dot_dimension_numbers<[1], [0], [0], [1], [0, 0, 1, 1], [], []>} : vector<8x128xf32>, vector<128x128xf32>, vector<8x128xf32> -> vector<8x128xf32>
    %cst_3 = arith.constant 0.000000e+00 : f32
    %3 = vector.broadcast %cst_3 : f32 to vector<8x128xf32>
    %4 = arith.maximumf %2, %3 : vector<8x128xf32>
    %c0_4 = arith.constant 0 : index
    %c0_5 = arith.constant 0 : index
    %5 = vector.load %arg6[%c0_4, %c0_5] : memref<8x128xf32, #tpu.memory_space<vmem>>, vector<8x128xf32>
    tpu.vector_store %arg6[%c0_4, %c0_5], %4 {strides = array<i32>} : memref<8x128xf32, #tpu.memory_space<vmem>>, vector<8x128xf32>,
    %c0_6 = arith.constant 0 : index
    %c0_7 = arith.constant 0 : index
    %6 = vector.load %arg6[%c0_6, %c0_7] : memref<8x128xf32, #tpu.memory_space<vmem>>, vector<8x128xf32>
    %c0_8 = arith.constant 0 : index
    %c0_9 = arith.constant 0 : index
    %7 = vector.load %arg3[%c0_8, %c0_9] : memref<128x128xf32, #tpu.memory_space<vmem>>, vector<128x128xf32>
    %cst_10 = arith.constant dense<0.000000e+00> : vector<8x128xf32>
    %8 = tpu.matmul %6, %7, %cst_10 {dimension_numbers = #tpu.dot_dimension_numbers<[1], [0], [0], [1], [0, 0, 1, 1], [], []>} : vector<8x128xf32>, vector<128x128xf32>, vector<8x128xf32> -> vector<8x128xf32>
    %cst_11 = arith.constant 0.000000e+00 : f32
    %9 = vector.broadcast %cst_11 : f32 to vector<8x128xf32>
    %10 = arith.maximumf %8, %9 : vector<8x128xf32>
    %c0_12 = arith.constant 0 : index
    %c0_13 = arith.constant 0 : index
    %11 = vector.load %arg7[%c0_12, %c0_13] : memref<8x128xf32, #tpu.memory_space<vmem>>, vector<8x128xf32>
    tpu.vector_store %arg7[%c0_12, %c0_13], %10 {strides = array<i32>} : memref<8x128xf32, #tpu.memory_space<vmem>>, vector<8x128xf32>,
    %c0_14 = arith.constant 0 : index
    %c0_15 = arith.constant 0 : index
    %12 = vector.load %arg7[%c0_14, %c0_15] : memref<8x128xf32, #tpu.memory_space<vmem>>, vector<8x128xf32>
    %c0_16 = arith.constant 0 : index
    %c0_17 = arith.constant 0 : index
    %13 = vector.load %arg4[%c0_16, %c0_17] : memref<128x128xf32, #tpu.memory_space<vmem>>, vector<128x128xf32>
    %cst_18 = arith.constant dense<0.000000e+00> : vector<8x128xf32>
    %14 = tpu.matmul %12, %13, %cst_18 {dimension_numbers = #tpu.dot_dimension_numbers<[1], [0], [0], [1], [0, 0, 1, 1], [], []>} : vector<8x128xf32>, vector<128x128xf32>, vector<8x128xf32> -> vector<8x128xf32>
    %c0_19 = arith.constant 0 : index
    %c0_20 = arith.constant 0 : index
    %15 = vector.load %arg5[%c0_19, %c0_20] : memref<8x128xf32, #tpu.memory_space<vmem>>, vector<8x128xf32>
    tpu.vector_store %arg5[%c0_19, %c0_20], %14 {strides = array<i32>} : memref<8x128xf32, #tpu.memory_space<vmem>>, vector<8x128xf32>,
    return
  }
  func.func @transform_0(%arg0: i32) -> (i32, i32) {
    %c0_i32 = arith.constant 0 : i32
    %c0_i32_0 = arith.constant 0 : i32
    return %arg0, %c0_i32 : i32, i32
  }
  func.func @transform_1(%arg0: i32) -> (i32, i32) {
    %c0_i32 = arith.constant 0 : i32
    %c0_i32_0 = arith.constant 0 : i32
    %c0_i32_1 = arith.constant 0 : i32
    return %c0_i32, %c0_i32_0 : i32, i32
  }
  func.func @transform_2(%arg0: i32) -> (i32, i32) {
    %c0_i32 = arith.constant 0 : i32
    %c0_i32_0 = arith.constant 0 : i32
    %c0_i32_1 = arith.constant 0 : i32
    return %c0_i32, %c0_i32_0 : i32, i32
  }
  func.func @transform_3(%arg0: i32) -> (i32, i32) {
    %c0_i32 = arith.constant 0 : i32
    %c0_i32_0 = arith.constant 0 : i32
    %c0_i32_1 = arith.constant 0 : i32
    return %c0_i32, %c0_i32_0 : i32, i32
  }
  func.func @transform_4(%arg0: i32) -> (i32, i32) {
    %c0_i32 = arith.constant 0 : i32
    %c0_i32_0 = arith.constant 0 : i32
    return %arg0, %c0_i32 : i32, i32
  }
}

module attributes {stable_mosaic.version = 11 : i64} {
  func.func @_mlp_kernel(%arg0: i32, %arg1: memref<8x128xf32, #tpu.memory_space<vmem>>, %arg2: memref<128x128xf32, #tpu.memory_space<vmem>>, %arg3: memref<128x128xf32, #tpu.memory_space<vmem>>, %arg4: memref<128x128xf32, #tpu.memory_space<vmem>>, %arg5: memref<8x128xf32, #tpu.memory_space<vmem>>, %arg6: memref<8x128xf32, #tpu.memory_space<vmem>>, %arg7: memref<8x128xf32, #tpu.memory_space<vmem>>) attributes {dimension_semantics = [#tpu.dimension_semantics<parallel>], iteration_bounds = array<i64: 1>, scalar_prefetch = 0 : i64, scratch_operands = 2 : i64, tpu.core_type = #tpu.core_type<tc>, window_params = [{transform_indices = @transform_0, window_bounds = array<i64: 8, 128>}, {pipeline_mode = #tpu.pipeline_mode<synchronous>, transform_indices = @transform_1, window_bounds = array<i64: 128, 128>}, {pipeline_mode = #tpu.pipeline_mode<synchronous>, transform_indices = @transform_2, window_bounds = array<i64: 128, 128>}, {pipeline_mode = #tpu.pipeline_mode<synchronous>, transform_indices = @transform_3, window_bounds = array<i64: 128, 128>}, {transform_indices = @transform_4, window_bounds = array<i64: 8, 128>}]} {
    %c0 = arith.constant 0 : index
    %c0_0 = arith.constant 0 : index
    %0 = vector.load %arg1[%c0, %c0_0] : memref<8x128xf32, #tpu.memory_space<vmem>>, vector<8x128xf32>
    %c0_1 = arith.constant 0 : index
    %c0_2 = arith.constant 0 : index
    %1 = vector.load %arg2[%c0_1, %c0_2] : memref<128x128xf32, #tpu.memory_space<vmem>>, vector<128x128xf32>
    %cst = arith.constant dense<0.000000e+00> : vector<8x128xf32>
    %2 = tpu.matmul %0, %1, %cst {dimension_numbers = #tpu.dot_dimension_numbers<[1], [0], [0], [1], [0, 0, 1, 1], [], []>} : vector<8x128xf32>, vector<128x128xf32>, vector<8x128xf32> -> vector<8x128xf32>
    %cst_3 = arith.constant 0.000000e+00 : f32
    %3 = vector.broadcast %cst_3 : f32 to vector<8x128xf32>
    %4 = arith.maximumf %2, %3 : vector<8x128xf32>
    %c0_4 = arith.constant 0 : index
    %c0_5 = arith.constant 0 : index
    %5 = vector.load %arg6[%c0_4, %c0_5] : memref<8x128xf32, #tpu.memory_space<vmem>>, vector<8x128xf32>
    tpu.vector_store %arg6[%c0_4, %c0_5], %4 {strides = array<i32>} : memref<8x128xf32, #tpu.memory_space<vmem>>, vector<8x128xf32>,
    %c0_6 = arith.constant 0 : index
    %c0_7 = arith.constant 0 : index
    %6 = vector.load %arg6[%c0_6, %c0_7] : memref<8x128xf32, #tpu.memory_space<vmem>>, vector<8x128xf32>
    %c0_8 = arith.constant 0 : index
    %c0_9 = arith.constant 0 : index
    %7 = vector.load %arg3[%c0_8, %c0_9] : memref<128x128xf32, #tpu.memory_space<vmem>>, vector<128x128xf32>
    %cst_10 = arith.constant dense<0.000000e+00> : vector<8x128xf32>
    %8 = tpu.matmul %6, %7, %cst_10 {dimension_numbers = #tpu.dot_dimension_numbers<[1], [0], [0], [1], [0, 0, 1, 1], [], []>} : vector<8x128xf32>, vector<128x128xf32>, vector<8x128xf32> -> vector<8x128xf32>
    %cst_11 = arith.constant 0.000000e+00 : f32
    %9 = vector.broadcast %cst_11 : f32 to vector<8x128xf32>
    %10 = arith.maximumf %8, %9 : vector<8x128xf32>
    %c0_12 = arith.constant 0 : index
    %c0_13 = arith.constant 0 : index
    %11 = vector.load %arg7[%c0_12, %c0_13] : memref<8x128xf32, #tpu.memory_space<vmem>>, vector<8x128xf32>
    tpu.vector_store %arg7[%c0_12, %c0_13], %10 {strides = array<i32>} : memref<8x128xf32, #tpu.memory_space<vmem>>, vector<8x128xf32>,
    %c0_14 = arith.constant 0 : index
    %c0_15 = arith.constant 0 : index
    %12 = vector.load %arg7[%c0_14, %c0_15] : memref<8x128xf32, #tpu.memory_space<vmem>>, vector<8x128xf32>
    %c0_16 = arith.constant 0 : index
    %c0_17 = arith.constant 0 : index
    %13 = vector.load %arg4[%c0_16, %c0_17] : memref<128x128xf32, #tpu.memory_space<vmem>>, vector<128x128xf32>
    %cst_18 = arith.constant dense<0.000000e+00> : vector<8x128xf32>
    %14 = tpu.matmul %12, %13, %cst_18 {dimension_numbers = #tpu.dot_dimension_numbers<[1], [0], [0], [1], [0, 0, 1, 1], [], []>} : vector<8x128xf32>, vector<128x128xf32>, vector<8x128xf32> -> vector<8x128xf32>
    %c0_19 = arith.constant 0 : index
    %c0_20 = arith.constant 0 : index
    %15 = vector.load %arg5[%c0_19, %c0_20] : memref<8x128xf32, #tpu.memory_space<vmem>>, vector<8x128xf32>
    tpu.vector_store %arg5[%c0_19, %c0_20], %14 {strides = array<i32>} : memref<8x128xf32, #tpu.memory_space<vmem>>, vector<8x128xf32>,
    return
  }
  func.func @transform_0(%arg0: i32) -> (i32, i32) {
    %c0_i32 = arith.constant 0 : i32
    %c0_i32_0 = arith.constant 0 : i32
    return %arg0, %c0_i32 : i32, i32
  }
  func.func @transform_1(%arg0: i32) -> (i32, i32) {
    %c0_i32 = arith.constant 0 : i32
    %c0_i32_0 = arith.constant 0 : i32
    %c0_i32_1 = arith.constant 0 : i32
    return %c0_i32, %c0_i32_0 : i32, i32
  }
  func.func @transform_2(%arg0: i32) -> (i32, i32) {
    %c0_i32 = arith.constant 0 : i32
    %c0_i32_0 = arith.constant 0 : i32
    %c0_i32_1 = arith.constant 0 : i32
    return %c0_i32, %c0_i32_0 : i32, i32
  }
  func.func @transform_3(%arg0: i32) -> (i32, i32) {
    %c0_i32 = arith.constant 0 : i32
    %c0_i32_0 = arith.constant 0 : i32
    %c0_i32_1 = arith.constant 0 : i32
    return %c0_i32, %c0_i32_0 : i32, i32
  }
  func.func @transform_4(%arg0: i32) -> (i32, i32) {
    %c0_i32 = arith.constant 0 : i32
    %c0_i32_0 = arith.constant 0 : i32
    return %arg0, %c0_i32 : i32, i32
  }
}

</mosaic_0001>

<bundles_post_ra>
// kernel: tpu_custom_call.1
= control target key start
LH: loop header
LB: loop body
LE: loop exit
PB: predicated region body
PF: predicated region fallthrough
CT: control target
= control target key end

     0   :  { %9 = vsyncpa [#allocation5], 0  ;;  %s844_s0 = inlined_call_operand.hbm [shape: f32[8,128], index: 0, kind: input, shape index: {}]   ;;  %s845_s1 = inlined_call_operand.hbm [shape: f32[128,128], index: 1, kind: input, shape index: {}]   ;;  %s846_s2 = inlined_call_operand.hbm [shape: f32[128,128], index: 2, kind: input, shape index: {}]   ;;  %s847_s3 = inlined_call_operand.hbm [shape: f32[128,128], index: 3, kind: input, shape index: {}]   ;;  %s848_s4 = inlined_call_operand.hbm [shape: f32[8,128], index: 4, kind: output, shape index: {}]  }
   0x1   :  { %10 = vsyncpa [#allocation8], 0 }
   0x2   :  { %11 = vsyncpa [#allocation11], 0 }
   0x3   :  { %12 = vsyncpa [#allocation6], 0  ;;  %s710_s15 = smov [#allocation7]   ;;  %s592_s19 = scalar_lea.hbm %s845_s1, 2048 }
   0x4   :  { %s28_s16 = sshll.u32 %s710_s15, 4  ;;  %p593_p0 = scmp.ne.s32.totalorder %s845_s1, %s592_s19  ;;  %s29_s16 = int_to_ptr.vmem [resolvable:$true] %s28_s16 }
   0x5   :  { %p596_p1 = scmp.lt.u32.totalorder %s592_s19, %s845_s1 }
   0x7   :  { %p598_p2 = pnand %p596_p1, %p593_p0 }
   0x9   :  { %601 = shalt.err (!%p598_p2)
}
   0xa   :  { %s602_s24 = scalar_lea.vmem %s29_s16, 2048  ;;  %p607_p4 = scmp.lt.s32.totalorder %s29_s16, %s29_s16 }
   0xb   :  { %p603_p3 = scmp.ne.s32.totalorder %s29_s16, %s602_s24  ;;  %p608_p5 = scmp.lt.s32.totalorder %s602_s24, %s602_s24 }
   0xd   :  { %p609_p6 = por %p608_p5, %p607_p4 }
   0xf   :  { %p610_p7 = pnand %p609_p6, %p603_p3 }
  0x11   :  { %613 = shalt.err (!%p610_p7)
}
  0x12   :  { %s711_s25 = smov 128   ;;  %s712_s26 = smov 8  }
  0x13   :  { %34 = dma.hbm_to_vmem [thread:$0]  %s845_s1, 2048, %s29_s16, [#allocation8], %s711_s25, %s711_s25, %s712_s26  }
  0x14   :  { %s713_s29 = smov [#allocation4]   ;;  %s714_s5 = smov [#allocation9]  }
  0x15   :  { %s19_s30 = sshll.u32 %s713_s29, 4  ;;  %s40_s6 = sshll.u32 %s714_s5, 4  ;;  %s20_s30 = int_to_ptr.vmem [resolvable:$true] %s19_s30  ;;  %s41_s6 = int_to_ptr.vmem [resolvable:$true] %s40_s6 }
  0x16   :  { %s614_s9 = scalar_lea.hbm %s844_s0, 128 }
  0x17   :  { %p615_p8 = scmp.ne.s32.totalorder %s844_s0, %s614_s9  ;;  %p618_p9 = scmp.lt.u32.totalorder %s614_s9, %s844_s0 }
  0x19   :  { %p620_p10 = pnand %p618_p9, %p615_p8 }
  0x1b   :  { %623 = shalt.err (!%p620_p10)
}
  0x1c   :  { %s624_s1 = scalar_lea.vmem %s20_s30, 128  ;;  %p629_p12 = scmp.lt.s32.totalorder %s20_s30, %s20_s30 }
  0x1d   :  { %p625_p11 = scmp.ne.s32.totalorder %s20_s30, %s624_s1  ;;  %p630_p13 = scmp.lt.s32.totalorder %s624_s1, %s624_s1 }
  0x1f   :  { %p631_p0 = por %p630_p13, %p629_p12 }
  0x21   :  { %p632_p1 = pnand %p631_p0, %p625_p11 }
  0x23   :  { %635 = shalt.err (!%p632_p1)
}
  0x24   :  { %22 = dma.hbm_to_vmem [thread:$0]  %s844_s0, 128, %s20_s30, [#allocation5]  }
  0x25   :  { %s636_s18 = scalar_lea.hbm %s846_s2, 2048 }
  0x26   :  { %p637_p2 = scmp.ne.s32.totalorder %s846_s2, %s636_s18  ;;  %p640_p3 = scmp.lt.u32.totalorder %s636_s18, %s846_s2 }
  0x28   :  { %p642_p4 = pnand %p640_p3, %p637_p2 }
  0x2a   :  { %645 = shalt.err (!%p642_p4)
}
  0x2b   :  { %s646_s23 = scalar_lea.vmem %s41_s6, 2048  ;;  %p651_p6 = scmp.lt.s32.totalorder %s41_s6, %s41_s6 }
  0x2c   :  { %p647_p5 = scmp.ne.s32.totalorder %s41_s6, %s646_s23  ;;  %p652_p7 = scmp.lt.s32.totalorder %s646_s23, %s646_s23 }
  0x2e   :  { %p653_p8 = por %p652_p7, %p651_p6 }
  0x30   :  { %p654_p9 = pnand %p653_p8, %p647_p5 }
  0x32   :  { %657 = shalt.err (!%p654_p9)
}
  0x33   :  { %46 = dma.hbm_to_vmem [thread:$0]  %s846_s2, 2048, %s41_s6, [#allocation8], %s711_s25, %s711_s25, %s712_s26  }
  0x34   :  { %s715_s27 = smov [#allocation10]   ;;  %s658_s5 = scalar_lea.hbm %s847_s3, 2048 }
  0x35   :  { %s52_s28 = sshll.u32 %s715_s27, 4  ;;  %p659_p10 = scmp.ne.s32.totalorder %s847_s3, %s658_s5  ;;  %s53_s28 = int_to_ptr.vmem [resolvable:$true] %s52_s28 }
  0x36   :  { %p662_p11 = scmp.lt.u32.totalorder %s658_s5, %s847_s3 }
  0x38   :  { %p664_p12 = pnand %p662_p11, %p659_p10 }
  0x3a   :  { %667 = shalt.err (!%p664_p12)
}
  0x3b   :  { %s668_s11 = scalar_lea.vmem %s53_s28, 2048  ;;  %p673_p0 = scmp.lt.s32.totalorder %s53_s28, %s53_s28 }
  0x3c   :  { %p669_p13 = scmp.ne.s32.totalorder %s53_s28, %s668_s11  ;;  %p674_p1 = scmp.lt.s32.totalorder %s668_s11, %s668_s11 }
  0x3e   :  { %p675_p2 = por %p674_p1, %p673_p0 }
  0x40   :  { %p676_p3 = pnand %p675_p2, %p669_p13 }
  0x42   :  { %679 = shalt.err (!%p676_p3)
}
  0x43   :  { %58 = dma.hbm_to_vmem [thread:$0]  %s847_s3, 2048, %s53_s28, [#allocation11], %s711_s25, %s711_s25, %s712_s26  }
  0x44   :  { %702 = dma.done.wait [#allocation5], 128  }
  0x45   :  { %703 = vsyncadd [#allocation5], 4294967168 }
  0x46   :  { %704 = dma.done.wait [#allocation8], 4096  }
  0x47   :  { %705 = vsyncadd [#allocation8], 4294963200 }
  0x48   :  { %706 = dma.done.wait [#allocation11], 2048  }
  0x49   :  { %707 = vsyncadd [#allocation11], 4294965248  ;;  %v716_v0 = vmov 0.0|0.0   ;;  %vm717_vm0 = vmmov 0   ;;  %v718_v1 = vmov 0.0   ;;  %v72_v2 = vld [vmem:[#allocation7] sm:$0xff] }
  0x4a   :  { %510 = vmatprep.subr.bf16.mxu0 %v716_v0  ;;  %437 = vmatprep.mubr.msk.f32.mxu0 %vm717_vm0, %v718_v1  ;;  %v73_v3 = vld [vmem:[#allocation7 + $0x8] sm:$0xff]  ;;  %v74_v4 = vld [vmem:[#allocation7 + $0x10] sm:$0xff]  ;;  %v75_v6 = vld [vmem:[#allocation7 + $0x18] sm:$0xff]  ;;  %s719_s3 = smov [#allocation12]  }
  0x4b   :  { %534 = vmatprep.subr.bf16.mxu1 %v716_v0  ;;  %472 = vmatprep.mubr.msk.f32.mxu1 %vm717_vm0, %v718_v1  ;;  %v511_v5 = vpack.c.bf16 %v73_v3, %v72_v2  ;;  %v514_v7 = vpack.c.bf16 %v75_v6, %v74_v4  ;;  %v76_v8 = vld [vmem:[#allocation7 + $0x20] sm:$0xff]  ;;  %v77_v9 = vld [vmem:[#allocation7 + $0x28] sm:$0xff]  ;;  %v163_v12 = vld [vmem:[#allocation9 + $0x10] sm:$0xff]  ;;  %s343_s25 = sshll.u32 %s719_s3, 4  ;;  %s344_s25 = int_to_ptr.vmem [resolvable:$true] %s343_s25 }
  0x4c   :  { %v161_v10 = vld [vmem:[#allocation9] sm:$0xff]  ;;  %v162_v11 = vld [vmem:[#allocation9 + $0x8] sm:$0xff]  ;;  %v164_v13 = vld [vmem:[#allocation9 + $0x18] sm:$0xff]  ;;  %v517_v14 = vpack.c.bf16 %v77_v9, %v76_v8  ;;  %s680_s26 = scalar_lea.vmem %s344_s25, 128  ;;  %p685_p5 = scmp.lt.s32.totalorder %s344_s25, %s344_s25 }
  0x4d   :  { %512 = vmatpush3.bf16.msra.mxu0 %v511_v5  ;;  %v535_v15 = vpack.c.bf16 %v162_v11, %v161_v10  ;;  %v78_v16 = vld [vmem:[#allocation7 + $0x30] sm:$0xff]  ;;  %v79_v17 = vld [vmem:[#allocation7 + $0x38] sm:$0xff]  ;;  %v538_v18 = vpack.c.bf16 %v164_v13, %v163_v12  ;;  %v165_v19 = vld [vmem:[#allocation9 + $0x20] sm:$0xff]  ;;  %p681_p4 = scmp.ne.s32.totalorder %s344_s25, %s680_s26  ;;  %p686_p6 = scmp.lt.s32.totalorder %s680_s26, %s680_s26 }
  0x4e   :  { %513 = vmatprep.subr.bf16.mxu0 %v716_v0  ;;  %v166_v20 = vld [vmem:[#allocation9 + $0x28] sm:$0xff]  ;;  %v520_v21 = vpack.c.bf16 %v79_v17, %v78_v16  ;;  %v80_v22 = vld [vmem:[#allocation7 + $0x40] sm:$0xff]  ;;  %v167_v25 = vld [vmem:[#allocation9 + $0x30] sm:$0xff] }
  0x4f   :  { %536 = vmatpush3.bf16.msra.mxu1 %v535_v15  ;;  %v81_v23 = vld [vmem:[#allocation7 + $0x48] sm:$0xff]  ;;  %v541_v24 = vpack.c.bf16 %v166_v20, %v165_v19  ;;  %v168_v26 = vld [vmem:[#allocation9 + $0x38] sm:$0xff]  ;;  %v82_v28 = vld [vmem:[#allocation7 + $0x50] sm:$0xff]  ;;  %p687_p7 = por %p686_p6, %p685_p5 }
  0x50   :  { %537 = vmatprep.subr.bf16.mxu1 %v716_v0  ;;  %v523_v27 = vpack.c.bf16 %v81_v23, %v80_v22  ;;  %v83_v29 = vld [vmem:[#allocation7 + $0x58] sm:$0xff]  ;;  %v544_v30 = vpack.c.bf16 %v168_v26, %v167_v25  ;;  %v169_v31 = vld [vmem:[#allocation9 + $0x40] sm:$0xff]  ;;  %v170_v32 = vld [vmem:[#allocation9 + $0x48] sm:$0xff] }
  0x51   :  { %515 = vmatpush3.bf16.msra.mxu0 %v514_v7  ;;  %v526_v33 = vpack.c.bf16 %v83_v29, %v82_v28  ;;  %v84_v34 = vld [vmem:[#allocation7 + $0x60] sm:$0xff]  ;;  %v85_v35 = vld [vmem:[#allocation7 + $0x68] sm:$0xff]  ;;  %v547_v36 = vpack.c.bf16 %v170_v32, %v169_v31  ;;  %v171_v37 = vld [vmem:[#allocation9 + $0x50] sm:$0xff]  ;;  %p688_p8 = pnand %p687_p7, %p681_p4 }
  0x52   :  { %516 = vmatprep.subr.bf16.mxu0 %v716_v0  ;;  %v172_v38 = vld [vmem:[#allocation9 + $0x58] sm:$0xff]  ;;  %v529_v39 = vpack.c.bf16 %v85_v35, %v84_v34  ;;  %v86_v40 = vld [vmem:[#allocation7 + $0x70] sm:$0xff]  ;;  %v173_v43 = vld [vmem:[#allocation9 + $0x60] sm:$0xff] }
  0x53   :  { %539 = vmatpush3.bf16.msra.mxu1 %v538_v18  ;;  %v87_v41 = vld [vmem:[#allocation7 + $0x78] sm:$0xff]  ;;  %v550_v42 = vpack.c.bf16 %v172_v38, %v171_v37  ;;  %v174_v44 = vld [vmem:[#allocation9 + $0x68] sm:$0xff]  ;;  %v175_v48 = vld [vmem:[#allocation9 + $0x70] sm:$0xff] }
  0x54   :  { %540 = vmatprep.subr.bf16.mxu1 %v716_v0  ;;  %v532_v45 = vpack.c.bf16 %v87_v41, %v86_v40  ;;  %v553_v46 = vpack.c.bf16 %v174_v44, %v173_v43  ;;  %v71_v47 = vld [vmem:[#allocation4] sm:$0xff]  ;;  %v250_v51 = vld [vmem:[#allocation10] sm:$0xff]  ;;  %v251_v52 = vld [vmem:[#allocation10 + $0x8] sm:$0xff] }
  0x55   :  { %518 = vmatpush3.bf16.msra.mxu0 %v517_v14  ;;  %v176_v49 = vld [vmem:[#allocation9 + $0x78] sm:$0xff]  ;;  %v252_v53 = vld [vmem:[#allocation10 + $0x10] sm:$0xff]  ;;  %v559_v54 = vpack.c.bf16 %v251_v52, %v250_v51  ;;  %v254_v57 = vld [vmem:[#allocation10 + $0x20] sm:$0xff] }
  0x56   :  { %519 = vmatprep.subr.bf16.mxu0 %v716_v0  ;;  %v556_v50 = vpack.c.bf16 %v176_v49, %v175_v48  ;;  %v253_v55 = vld [vmem:[#allocation10 + $0x18] sm:$0xff]  ;;  %v255_v58 = vld [vmem:[#allocation10 + $0x28] sm:$0xff]  ;;  %v256_v60 = vld [vmem:[#allocation10 + $0x30] sm:$0xff] }
  0x57   :  { %542 = vmatpush3.bf16.msra.mxu1 %v541_v24  ;;  %v562_v56 = vpack.c.bf16 %v253_v55, %v252_v53  ;;  %v565_v59 = vpack.c.bf16 %v255_v58, %v254_v57  ;;  %v257_v61 = vld [vmem:[#allocation10 + $0x38] sm:$0xff]  ;;  %v258_v63 = vld [vmem:[#allocation10 + $0x40] sm:$0xff]  ;;  %v260_v3 = vld [vmem:[#allocation10 + $0x50] sm:$0xff] }
  0x58   :  { %543 = vmatprep.subr.bf16.mxu1 %v716_v0  ;;  %v568_v62 = vpack.c.bf16 %v257_v61, %v256_v60  ;;  %v261_v4 = vld [vmem:[#allocation10 + $0x58] sm:$0xff]  ;;  %v262_v6 = vld [vmem:[#allocation10 + $0x60] sm:$0xff]  ;;  %v263_v7 = vld [vmem:[#allocation10 + $0x68] sm:$0xff] }
  0x59   :  { %521 = vmatpush3.bf16.msra.mxu0 %v520_v21  ;;  %v574_v5 = vpack.c.bf16 %v261_v4, %v260_v3  ;;  %v577_v8 = vpack.c.bf16 %v263_v7, %v262_v6  ;;  %v264_v12 = vld [vmem:[#allocation10 + $0x70] sm:$0xff]  ;;  %v265_v13 = vld [vmem:[#allocation10 + $0x78] sm:$0xff] }
  0x5a   :  { %522 = vmatprep.subr.bf16.mxu0 %v716_v0  ;;  %v580_v14 = vpack.c.bf16 %v265_v13, %v264_v12 }
  0x5b   :  { %545 = vmatpush3.bf16.msra.mxu1 %v544_v30 }
  0x5c   :  { %546 = vmatprep.subr.bf16.mxu1 %v716_v0 }
  0x5d   :  { %524 = vmatpush3.bf16.msra.mxu0 %v523_v27 }
  0x5e   :  { %525 = vmatprep.subr.bf16.mxu0 %v716_v0 }
  0x5f   :  { %548 = vmatpush3.bf16.msra.mxu1 %v547_v36 }
  0x60   :  { %549 = vmatprep.subr.bf16.mxu1 %v716_v0 }
  0x61   :  { %527 = vmatpush3.bf16.msra.mxu0 %v526_v33 }
  0x62   :  { %528 = vmatprep.subr.bf16.mxu0 %v716_v0 }
  0x63   :  { %551 = vmatpush3.bf16.msra.mxu1 %v550_v42 }
  0x64   :  { %552 = vmatprep.subr.bf16.mxu1 %v716_v0 }
  0x65   :  { %530 = vmatpush3.bf16.msra.mxu0 %v529_v39 }
  0x66   :  { %531 = vmatprep.subr.bf16.mxu0 %v716_v0 }
  0x67   :  { %554 = vmatpush3.bf16.msra.mxu1 %v553_v46 }
  0x68   :  { %555 = vmatprep.subr.bf16.mxu1 %v716_v0 }
  0x69   :  { %533 = vmatpush3.bf16.msra.mxu0 %v532_v45 }
  0x6a   :  { %558 = vmatprep.subr.bf16.mxu0 %v716_v0 }
  0x6b   :  { %557 = vmatpush3.bf16.msra.mxu1 %v556_v50 }
  0x6c   :  { %438 = vmatmul.mubr.f32.vlgmr.msra.gmra.mrb[0].mxu0 %v71_v47 }
  0x6d   :  { %507 = vmatprep.mubr.msk.f32.mxu0 %vm717_vm0, %v718_v1  ;;  %560 = vmatpush3.bf16.msra.mxu0 %v559_v54  ;;  %v259_v1 = vld [vmem:[#allocation10 + $0x48] sm:$0xff] }
  0x6e   :  { %561 = vmatprep.subr.bf16.mxu0 %v716_v0  ;;  %v571_v2 = vpack.c.bf16 %v259_v1, %v258_v63 }
  0x71   :  { %563 = vmatpush3.bf16.msra.mxu0 %v562_v56 }
  0x72   :  { %564 = vmatprep.subr.bf16.mxu0 %v716_v0 }
  0x75   :  { %566 = vmatpush3.bf16.msra.mxu0 %v565_v59 }
  0x76   :  { %567 = vmatprep.subr.bf16.mxu0 %v716_v0 }
  0x79   :  { %569 = vmatpush3.bf16.msra.mxu0 %v568_v62 }
  0x7a   :  { %570 = vmatprep.subr.bf16.mxu0 %v716_v0 }
  0x7d   :  { %572 = vmatpush3.bf16.msra.mxu0 %v571_v2 }
  0x7e   :  { %573 = vmatprep.subr.bf16.mxu0 %v716_v0 }
  0x81   :  { %575 = vmatpush3.bf16.msra.mxu0 %v574_v5 }
  0x82   :  { %576 = vmatprep.subr.bf16.mxu0 %v716_v0 }
  0x85   :  { %578 = vmatpush3.bf16.msra.mxu0 %v577_v8 }
  0x86   :  { %579 = vmatprep.subr.bf16.mxu0 %v716_v0 }
  0x89   :  { %581 = vmatpush3.bf16.msra.mxu0 %v580_v14 }
 0x13f   :  { %v154_v9 = vpop.f32.mrb[0].mxu0 }
 0x140   :  { %v158_v10 = vmax.f32 %v154_v9, 0.0  ;;  %v439_v11 = vpop.f32.mrb[1].mxu0 }
 0x142   :  { %473 = vmatmul.mubr.f32.vlgmr.msra.gmra.mrb[0].mxu1 %v158_v10 }
 0x215   :  { %v243_v15 = vpop.f32.mrb[0].mxu1 }
 0x216   :  { %v247_v16 = vmax.f32 %v243_v15, 0.0  ;;  %v474_v17 = vpop.f32.mrb[1].mxu1 }
 0x218   :  { %508 = vmatmul.mubr.f32.vlgmr.msra.gmra.mrb[2].mxu0 %v247_v16 }
 0x2eb   :  { %v332_v18 = vpop.f32.mrb[2].mxu0 }
 0x2ec   :  { %336 = vst [vmem:[#allocation12] sm:$0xff] %v332_v18  ;;  %v509_v19 = vpop.f32.mrb[3].mxu0 }
 0x2ed   :  { %691 = shalt.err (!%p688_p8)
}
 0x2ee   :  { %s692_s1 = scalar_lea.hbm %s848_s4, 128 }
 0x2ef   :  { %p693_p9 = scmp.ne.s32.totalorder %s848_s4, %s692_s1  ;;  %p696_p10 = scmp.lt.u32.totalorder %s692_s1, %s848_s4 }
 0x2f1   :  { %p698_p11 = pnand %p696_p10, %p693_p9 }
 0x2f3   :  { %701 = shalt.err (!%p698_p11)
}
 0x2f4   :  { %346 = dma.vmem_to_hbm [thread:$0]  %s344_s25, 128, %s848_s4, [#allocation6]  }
 0x2f5   :  { %708 = dma.done.wait [#allocation6], 128  }
 0x2f6   :  { %709 = vsyncadd [#allocation6], 4294967168 }
 0x2f7   :  { %350 = vsyncpa [#allocation5], 1 }
 0x2f8   :  { %351 = vsyncpa [#allocation8], 1 }
 0x2f9   :  { %352 = vsyncpa [#allocation11], 1 }
 0x2fa   :  { %353 = vsyncpa [#allocation6], 1 }

// kernel: tpu_custom_call.1
= control target key start
LH: loop header
LB: loop body
LE: loop exit
PB: predicated region body
PF: predicated region fallthrough
CT: control target
= control target key end

     0   :  { %9 = vsyncpa [#allocation5], 0  ;;  %s844_s0 = inlined_call_operand.hbm [shape: f32[8,128], index: 0, kind: input, shape index: {}]   ;;  %s845_s1 = inlined_call_operand.hbm [shape: f32[128,128], index: 1, kind: input, shape index: {}]   ;;  %s846_s2 = inlined_call_operand.hbm [shape: f32[128,128], index: 2, kind: input, shape index: {}]   ;;  %s847_s3 = inlined_call_operand.hbm [shape: f32[128,128], index: 3, kind: input, shape index: {}]   ;;  %s848_s4 = inlined_call_operand.hbm [shape: f32[8,128], index: 4, kind: output, shape index: {}]  }
   0x1   :  { %10 = vsyncpa [#allocation8], 0 }
   0x2   :  { %11 = vsyncpa [#allocation11], 0 }
   0x3   :  { %12 = vsyncpa [#allocation6], 0  ;;  %s710_s15 = smov [#allocation7]   ;;  %s592_s19 = scalar_lea.hbm %s845_s1, 2048 }
   0x4   :  { %s28_s16 = sshll.u32 %s710_s15, 4  ;;  %p593_p0 = scmp.ne.s32.totalorder %s845_s1, %s592_s19  ;;  %s29_s16 = int_to_ptr.vmem [resolvable:$true] %s28_s16 }
   0x5   :  { %p596_p1 = scmp.lt.u32.totalorder %s592_s19, %s845_s1 }
   0x7   :  { %p598_p2 = pnand %p596_p1, %p593_p0 }
   0x9   :  { %601 = shalt.err (!%p598_p2)
}
   0xa   :  { %s602_s24 = scalar_lea.vmem %s29_s16, 2048  ;;  %p607_p4 = scmp.lt.s32.totalorder %s29_s16, %s29_s16 }
   0xb   :  { %p603_p3 = scmp.ne.s32.totalorder %s29_s16, %s602_s24  ;;  %p608_p5 = scmp.lt.s32.totalorder %s602_s24, %s602_s24 }
   0xd   :  { %p609_p6 = por %p608_p5, %p607_p4 }
   0xf   :  { %p610_p7 = pnand %p609_p6, %p603_p3 }
  0x11   :  { %613 = shalt.err (!%p610_p7)
}
  0x12   :  { %s711_s25 = smov 128   ;;  %s712_s26 = smov 8  }
  0x13   :  { %34 = dma.hbm_to_vmem [thread:$0]  %s845_s1, 2048, %s29_s16, [#allocation8], %s711_s25, %s711_s25, %s712_s26  }
  0x14   :  { %s713_s29 = smov [#allocation4]   ;;  %s714_s5 = smov [#allocation9]  }
  0x15   :  { %s19_s30 = sshll.u32 %s713_s29, 4  ;;  %s40_s6 = sshll.u32 %s714_s5, 4  ;;  %s20_s30 = int_to_ptr.vmem [resolvable:$true] %s19_s30  ;;  %s41_s6 = int_to_ptr.vmem [resolvable:$true] %s40_s6 }
  0x16   :  { %s614_s9 = scalar_lea.hbm %s844_s0, 128 }
  0x17   :  { %p615_p8 = scmp.ne.s32.totalorder %s844_s0, %s614_s9  ;;  %p618_p9 = scmp.lt.u32.totalorder %s614_s9, %s844_s0 }
  0x19   :  { %p620_p10 = pnand %p618_p9, %p615_p8 }
  0x1b   :  { %623 = shalt.err (!%p620_p10)
}
  0x1c   :  { %s624_s1 = scalar_lea.vmem %s20_s30, 128  ;;  %p629_p12 = scmp.lt.s32.totalorder %s20_s30, %s20_s30 }
  0x1d   :  { %p625_p11 = scmp.ne.s32.totalorder %s20_s30, %s624_s1  ;;  %p630_p13 = scmp.lt.s32.totalorder %s624_s1, %s624_s1 }
  0x1f   :  { %p631_p0 = por %p630_p13, %p629_p12 }
  0x21   :  { %p632_p1 = pnand %p631_p0, %p625_p11 }
  0x23   :  { %635 = shalt.err (!%p632_p1)
}
  0x24   :  { %22 = dma.hbm_to_vmem [thread:$0]  %s844_s0, 128, %s20_s30, [#allocation5]  }
  0x25   :  { %s636_s18 = scalar_lea.hbm %s846_s2, 2048 }
  0x26   :  { %p637_p2 = scmp.ne.s32.totalorder %s846_s2, %s636_s18  ;;  %p640_p3 = scmp.lt.u32.totalorder %s636_s18, %s846_s2 }
  0x28   :  { %p642_p4 = pnand %p640_p3, %p637_p2 }
  0x2a   :  { %645 = shalt.err (!%p642_p4)
}
  0x2b   :  { %s646_s23 = scalar_lea.vmem %s41_s6, 2048  ;;  %p651_p6 = scmp.lt.s32.totalorder %s41_s6, %s41_s6 }
  0x2c   :  { %p647_p5 = scmp.ne.s32.totalorder %s41_s6, %s646_s23  ;;  %p652_p7 = scmp.lt.s32.totalorder %s646_s23, %s646_s23 }
  0x2e   :  { %p653_p8 = por %p652_p7, %p651_p6 }
  0x30   :  { %p654_p9 = pnand %p653_p8, %p647_p5 }
  0x32   :  { %657 = shalt.err (!%p654_p9)
}
  0x33   :  { %46 = dma.hbm_to_vmem [thread:$0]  %s846_s2, 2048, %s41_s6, [#allocation8], %s711_s25, %s711_s25, %s712_s26  }
  0x34   :  { %s715_s27 = smov [#allocation10]   ;;  %s658_s5 = scalar_lea.hbm %s847_s3, 2048 }
  0x35   :  { %s52_s28 = sshll.u32 %s715_s27, 4  ;;  %p659_p10 = scmp.ne.s32.totalorder %s847_s3, %s658_s5  ;;  %s53_s28 = int_to_ptr.vmem [resolvable:$true] %s52_s28 }
  0x36   :  { %p662_p11 = scmp.lt.u32.totalorder %s658_s5, %s847_s3 }
  0x38   :  { %p664_p12 = pnand %p662_p11, %p659_p10 }
  0x3a   :  { %667 = shalt.err (!%p664_p12)
}
  0x3b   :  { %s668_s11 = scalar_lea.vmem %s53_s28, 2048  ;;  %p673_p0 = scmp.lt.s32.totalorder %s53_s28, %s53_s28 }
  0x3c   :  { %p669_p13 = scmp.ne.s32.totalorder %s53_s28, %s668_s11  ;;  %p674_p1 = scmp.lt.s32.totalorder %s668_s11, %s668_s11 }
  0x3e   :  { %p675_p2 = por %p674_p1, %p673_p0 }
  0x40   :  { %p676_p3 = pnand %p675_p2, %p669_p13 }
  0x42   :  { %679 = shalt.err (!%p676_p3)
}
  0x43   :  { %58 = dma.hbm_to_vmem [thread:$0]  %s847_s3, 2048, %s53_s28, [#allocation11], %s711_s25, %s711_s25, %s712_s26  }
  0x44   :  { %702 = dma.done.wait [#allocation5], 128  }
  0x45   :  { %703 = vsyncadd [#allocation5], 4294967168 }
  0x46   :  { %704 = dma.done.wait [#allocation8], 4096  }
  0x47   :  { %705 = vsyncadd [#allocation8], 4294963200 }
  0x48   :  { %706 = dma.done.wait [#allocation11], 2048  }
  0x49   :  { %707 = vsyncadd [#allocation11], 4294965248  ;;  %v716_v0 = vmov 0.0|0.0   ;;  %vm717_vm0 = vmmov 0   ;;  %v718_v1 = vmov 0.0   ;;  %v72_v2 = vld [vmem:[#allocation7] sm:$0xff] }
  0x4a   :  { %510 = vmatprep.subr.bf16.mxu0 %v716_v0  ;;  %437 = vmatprep.mubr.msk.f32.mxu0 %vm717_vm0, %v718_v1  ;;  %v73_v3 = vld [vmem:[#allocation7 + $0x8] sm:$0xff]  ;;  %v74_v4 = vld [vmem:[#allocation7 + $0x10] sm:$0xff]  ;;  %v75_v6 = vld [vmem:[#allocation7 + $0x18] sm:$0xff]  ;;  %s719_s3 = smov [#allocation12]  }
  0x4b   :  { %534 = vmatprep.subr.bf16.mxu1 %v716_v0  ;;  %472 = vmatprep.mubr.msk.f32.mxu1 %vm717_vm0, %v718_v1  ;;  %v511_v5 = vpack.c.bf16 %v73_v3, %v72_v2  ;;  %v514_v7 = vpack.c.bf16 %v75_v6, %v74_v4  ;;  %v76_v8 = vld [vmem:[#allocation7 + $0x20] sm:$0xff]  ;;  %v77_v9 = vld [vmem:[#allocation7 + $0x28] sm:$0xff]  ;;  %v163_v12 = vld [vmem:[#allocation9 + $0x10] sm:$0xff]  ;;  %s343_s25 = sshll.u32 %s719_s3, 4  ;;  %s344_s25 = int_to_ptr.vmem [resolvable:$true] %s343_s25 }
  0x4c   :  { %v161_v10 = vld [vmem:[#allocation9] sm:$0xff]  ;;  %v162_v11 = vld [vmem:[#allocation9 + $0x8] sm:$0xff]  ;;  %v164_v13 = vld [vmem:[#allocation9 + $0x18] sm:$0xff]  ;;  %v517_v14 = vpack.c.bf16 %v77_v9, %v76_v8  ;;  %s680_s26 = scalar_lea.vmem %s344_s25, 128  ;;  %p685_p5 = scmp.lt.s32.totalorder %s344_s25, %s344_s25 }
  0x4d   :  { %512 = vmatpush3.bf16.msra.mxu0 %v511_v5  ;;  %v535_v15 = vpack.c.bf16 %v162_v11, %v161_v10  ;;  %v78_v16 = vld [vmem:[#allocation7 + $0x30] sm:$0xff]  ;;  %v79_v17 = vld [vmem:[#allocation7 + $0x38] sm:$0xff]  ;;  %v538_v18 = vpack.c.bf16 %v164_v13, %v163_v12  ;;  %v165_v19 = vld [vmem:[#allocation9 + $0x20] sm:$0xff]  ;;  %p681_p4 = scmp.ne.s32.totalorder %s344_s25, %s680_s26  ;;  %p686_p6 = scmp.lt.s32.totalorder %s680_s26, %s680_s26 }
  0x4e   :  { %513 = vmatprep.subr.bf16.mxu0 %v716_v0  ;;  %v166_v20 = vld [vmem:[#allocation9 + $0x28] sm:$0xff]  ;;  %v520_v21 = vpack.c.bf16 %v79_v17, %v78_v16  ;;  %v80_v22 = vld [vmem:[#allocation7 + $0x40] sm:$0xff]  ;;  %v167_v25 = vld [vmem:[#allocation9 + $0x30] sm:$0xff] }
  0x4f   :  { %536 = vmatpush3.bf16.msra.mxu1 %v535_v15  ;;  %v81_v23 = vld [vmem:[#allocation7 + $0x48] sm:$0xff]  ;;  %v541_v24 = vpack.c.bf16 %v166_v20, %v165_v19  ;;  %v168_v26 = vld [vmem:[#allocation9 + $0x38] sm:$0xff]  ;;  %v82_v28 = vld [vmem:[#allocation7 + $0x50] sm:$0xff]  ;;  %p687_p7 = por %p686_p6, %p685_p5 }
  0x50   :  { %537 = vmatprep.subr.bf16.mxu1 %v716_v0  ;;  %v523_v27 = vpack.c.bf16 %v81_v23, %v80_v22  ;;  %v83_v29 = vld [vmem:[#allocation7 + $0x58] sm:$0xff]  ;;  %v544_v30 = vpack.c.bf16 %v168_v26, %v167_v25  ;;  %v169_v31 = vld [vmem:[#allocation9 + $0x40] sm:$0xff]  ;;  %v170_v32 = vld [vmem:[#allocation9 + $0x48] sm:$0xff] }
  0x51   :  { %515 = vmatpush3.bf16.msra.mxu0 %v514_v7  ;;  %v526_v33 = vpack.c.bf16 %v83_v29, %v82_v28  ;;  %v84_v34 = vld [vmem:[#allocation7 + $0x60] sm:$0xff]  ;;  %v85_v35 = vld [vmem:[#allocation7 + $0x68] sm:$0xff]  ;;  %v547_v36 = vpack.c.bf16 %v170_v32, %v169_v31  ;;  %v171_v37 = vld [vmem:[#allocation9 + $0x50] sm:$0xff]  ;;  %p688_p8 = pnand %p687_p7, %p681_p4 }
  0x52   :  { %516 = vmatprep.subr.bf16.mxu0 %v716_v0  ;;  %v172_v38 = vld [vmem:[#allocation9 + $0x58] sm:$0xff]  ;;  %v529_v39 = vpack.c.bf16 %v85_v35, %v84_v34  ;;  %v86_v40 = vld [vmem:[#allocation7 + $0x70] sm:$0xff]  ;;  %v173_v43 = vld [vmem:[#allocation9 + $0x60] sm:$0xff] }
  0x53   :  { %539 = vmatpush3.bf16.msra.mxu1 %v538_v18  ;;  %v87_v41 = vld [vmem:[#allocation7 + $0x78] sm:$0xff]  ;;  %v550_v42 = vpack.c.bf16 %v172_v38, %v171_v37  ;;  %v174_v44 = vld [vmem:[#allocation9 + $0x68] sm:$0xff]  ;;  %v175_v48 = vld [vmem:[#allocation9 + $0x70] sm:$0xff] }
  0x54   :  { %540 = vmatprep.subr.bf16.mxu1 %v716_v0  ;;  %v532_v45 = vpack.c.bf16 %v87_v41, %v86_v40  ;;  %v553_v46 = vpack.c.bf16 %v174_v44, %v173_v43  ;;  %v71_v47 = vld [vmem:[#allocation4] sm:$0xff]  ;;  %v250_v51 = vld [vmem:[#allocation10] sm:$0xff]  ;;  %v251_v52 = vld [vmem:[#allocation10 + $0x8] sm:$0xff] }
  0x55   :  { %518 = vmatpush3.bf16.msra.mxu0 %v517_v14  ;;  %v176_v49 = vld [vmem:[#allocation9 + $0x78] sm:$0xff]  ;;  %v252_v53 = vld [vmem:[#allocation10 + $0x10] sm:$0xff]  ;;  %v559_v54 = vpack.c.bf16 %v251_v52, %v250_v51  ;;  %v254_v57 = vld [vmem:[#allocation10 + $0x20] sm:$0xff] }
  0x56   :  { %519 = vmatprep.subr.bf16.mxu0 %v716_v0  ;;  %v556_v50 = vpack.c.bf16 %v176_v49, %v175_v48  ;;  %v253_v55 = vld [vmem:[#allocation10 + $0x18] sm:$0xff]  ;;  %v255_v58 = vld [vmem:[#allocation10 + $0x28] sm:$0xff]  ;;  %v256_v60 = vld [vmem:[#allocation10 + $0x30] sm:$0xff] }
  0x57   :  { %542 = vmatpush3.bf16.msra.mxu1 %v541_v24  ;;  %v562_v56 = vpack.c.bf16 %v253_v55, %v252_v53  ;;  %v565_v59 = vpack.c.bf16 %v255_v58, %v254_v57  ;;  %v257_v61 = vld [vmem:[#allocation10 + $0x38] sm:$0xff]  ;;  %v258_v63 = vld [vmem:[#allocation10 + $0x40] sm:$0xff]  ;;  %v260_v3 = vld [vmem:[#allocation10 + $0x50] sm:$0xff] }
  0x58   :  { %543 = vmatprep.subr.bf16.mxu1 %v716_v0  ;;  %v568_v62 = vpack.c.bf16 %v257_v61, %v256_v60  ;;  %v261_v4 = vld [vmem:[#allocation10 + $0x58] sm:$0xff]  ;;  %v262_v6 = vld [vmem:[#allocation10 + $0x60] sm:$0xff]  ;;  %v263_v7 = vld [vmem:[#allocation10 + $0x68] sm:$0xff] }
  0x59   :  { %521 = vmatpush3.bf16.msra.mxu0 %v520_v21  ;;  %v574_v5 = vpack.c.bf16 %v261_v4, %v260_v3  ;;  %v577_v8 = vpack.c.bf16 %v263_v7, %v262_v6  ;;  %v264_v12 = vld [vmem:[#allocation10 + $0x70] sm:$0xff]  ;;  %v265_v13 = vld [vmem:[#allocation10 + $0x78] sm:$0xff] }
  0x5a   :  { %522 = vmatprep.subr.bf16.mxu0 %v716_v0  ;;  %v580_v14 = vpack.c.bf16 %v265_v13, %v264_v12 }
  0x5b   :  { %545 = vmatpush3.bf16.msra.mxu1 %v544_v30 }
  0x5c   :  { %546 = vmatprep.subr.bf16.mxu1 %v716_v0 }
  0x5d   :  { %524 = vmatpush3.bf16.msra.mxu0 %v523_v27 }
  0x5e   :  { %525 = vmatprep.subr.bf16.mxu0 %v716_v0 }
  0x5f   :  { %548 = vmatpush3.bf16.msra.mxu1 %v547_v36 }
  0x60   :  { %549 = vmatprep.subr.bf16.mxu1 %v716_v0 }
  0x61   :  { %527 = vmatpush3.bf16.msra.mxu0 %v526_v33 }
  0x62   :  { %528 = vmatprep.subr.bf16.mxu0 %v716_v0 }
  0x63   :  { %551 = vmatpush3.bf16.msra.mxu1 %v550_v42 }
  0x64   :  { %552 = vmatprep.subr.bf16.mxu1 %v716_v0 }
  0x65   :  { %530 = vmatpush3.bf16.msra.mxu0 %v529_v39 }
  0x66   :  { %531 = vmatprep.subr.bf16.mxu0 %v716_v0 }
  0x67   :  { %554 = vmatpush3.bf16.msra.mxu1 %v553_v46 }
  0x68   :  { %555 = vmatprep.subr.bf16.mxu1 %v716_v0 }
  0x69   :  { %533 = vmatpush3.bf16.msra.mxu0 %v532_v45 }
  0x6a   :  { %558 = vmatprep.subr.bf16.mxu0 %v716_v0 }
  0x6b   :  { %557 = vmatpush3.bf16.msra.mxu1 %v556_v50 }
  0x6c   :  { %438 = vmatmul.mubr.f32.vlgmr.msra.gmra.mrb[0].mxu0 %v71_v47 }
  0x6d   :  { %507 = vmatprep.mubr.msk.f32.mxu0 %vm717_vm0, %v718_v1  ;;  %560 = vmatpush3.bf16.msra.mxu0 %v559_v54  ;;  %v259_v1 = vld [vmem:[#allocation10 + $0x48] sm:$0xff] }
  0x6e   :  { %561 = vmatprep.subr.bf16.mxu0 %v716_v0  ;;  %v571_v2 = vpack.c.bf16 %v259_v1, %v258_v63 }
  0x71   :  { %563 = vmatpush3.bf16.msra.mxu0 %v562_v56 }
  0x72   :  { %564 = vmatprep.subr.bf16.mxu0 %v716_v0 }
  0x75   :  { %566 = vmatpush3.bf16.msra.mxu0 %v565_v59 }
  0x76   :  { %567 = vmatprep.subr.bf16.mxu0 %v716_v0 }
  0x79   :  { %569 = vmatpush3.bf16.msra.mxu0 %v568_v62 }
  0x7a   :  { %570 = vmatprep.subr.bf16.mxu0 %v716_v0 }
  0x7d   :  { %572 = vmatpush3.bf16.msra.mxu0 %v571_v2 }
  0x7e   :  { %573 = vmatprep.subr.bf16.mxu0 %v716_v0 }
  0x81   :  { %575 = vmatpush3.bf16.msra.mxu0 %v574_v5 }
  0x82   :  { %576 = vmatprep.subr.bf16.mxu0 %v716_v0 }
  0x85   :  { %578 = vmatpush3.bf16.msra.mxu0 %v577_v8 }
  0x86   :  { %579 = vmatprep.subr.bf16.mxu0 %v716_v0 }
  0x89   :  { %581 = vmatpush3.bf16.msra.mxu0 %v580_v14 }
 0x13f   :  { %v154_v9 = vpop.f32.mrb[0].mxu0 }
 0x140   :  { %v158_v10 = vmax.f32 %v154_v9, 0.0  ;;  %v439_v11 = vpop.f32.mrb[1].mxu0 }
 0x142   :  { %473 = vmatmul.mubr.f32.vlgmr.msra.gmra.mrb[0].mxu1 %v158_v10 }
 0x215   :  { %v243_v15 = vpop.f32.mrb[0].mxu1 }
 0x216   :  { %v247_v16 = vmax.f32 %v243_v15, 0.0  ;;  %v474_v17 = vpop.f32.mrb[1].mxu1 }
 0x218   :  { %508 = vmatmul.mubr.f32.vlgmr.msra.gmra.mrb[2].mxu0 %v247_v16 }
 0x2eb   :  { %v332_v18 = vpop.f32.mrb[2].mxu0 }
 0x2ec   :  { %336 = vst [vmem:[#allocation12] sm:$0xff] %v332_v18  ;;  %v509_v19 = vpop.f32.mrb[3].mxu0 }
 0x2ed   :  { %691 = shalt.err (!%p688_p8)
}
 0x2ee   :  { %s692_s1 = scalar_lea.hbm %s848_s4, 128 }
 0x2ef   :  { %p693_p9 = scmp.ne.s32.totalorder %s848_s4, %s692_s1  ;;  %p696_p10 = scmp.lt.u32.totalorder %s692_s1, %s848_s4 }
 0x2f1   :  { %p698_p11 = pnand %p696_p10, %p693_p9 }
 0x2f3   :  { %701 = shalt.err (!%p698_p11)
}
 0x2f4   :  { %346 = dma.vmem_to_hbm [thread:$0]  %s344_s25, 128, %s848_s4, [#allocation6]  }
 0x2f5   :  { %708 = dma.done.wait [#allocation6], 128  }
 0x2f6   :  { %709 = vsyncadd [#allocation6], 4294967168 }
 0x2f7   :  { %350 = vsyncpa [#allocation5], 1 }
 0x2f8   :  { %351 = vsyncpa [#allocation8], 1 }
 0x2f9   :  { %352 = vsyncpa [#allocation11], 1 }
 0x2fa   :  { %353 = vsyncpa [#allocation6], 1 }

</bundles_post_ra>
